<compile_context>
chip_gen: v5e
topology: v5e:2x2
jax: 0.10.0
libtpu: 0.0.40
codegen_flags: <defaults>
</compile_context>

<pallas_src>
import functools

import jax
import jax.numpy as jnp
from jax.experimental import pallas as pl
from jax.experimental.pallas import tpu as pltpu

ACTS = {"relu": jax.nn.relu, "sigmoid": jax.nn.sigmoid, "tanh": jnp.tanh}

_LANE = 128      # lane width (last-dim alignment)
_SUBLANE = 8     # sublane width (second-to-last-dim alignment)
_TB_DEFAULT = 256  # batch tile (MXU granularity on v6e/v7x)


def _round_up(x: int, m: int) -> int:
    return ((x + m - 1) // m) * m


def _make_actor_kernel(num_hidden_layers: int, activation: str, max_action: float):
    act = ACTS[activation]

    def kernel(*refs):
        # refs = (x, w0, b0, w1, b1, ..., w_out, b_out, out)
        x_ref = refs[0]
        out_ref = refs[-1]
        p_refs = refs[1:-1]

        # bf16 operands for the MXU, f32 accumulation / epilogue.
        h = x_ref[...].astype(jnp.bfloat16)
        for i in range(num_hidden_layers):
            w = p_refs[2 * i][...]               # (in_p, out_p) bf16, VMEM-resident
            b = p_refs[2 * i + 1][...]           # (1, out_p) f32 -> broadcasts over batch
            z = jnp.dot(h, w, preferred_element_type=jnp.float32) + b
            h = act(z).astype(jnp.bfloat16)

        w_out = p_refs[-2][...]
        b_out = p_refs[-1][...]
        logits = jnp.dot(h, w_out, preferred_element_type=jnp.float32) + b_out
        out_ref[...] = (max_action * jnp.tanh(logits)).astype(out_ref.dtype)

    return kernel


@functools.partial(jax.jit, static_argnames=("activation", "max_action"))
def actor_forward(x, params, *, activation="relu", max_action=1.0):
    """params: list of (W, b) pairs; hidden layers first, final action layer last.

    W has shape (in_features, out_features); b has shape (out_features,).
    """
    num_hidden = len(params) - 1
    kernel = _make_actor_kernel(num_hidden, activation, float(max_action))

    batch, in_dim = x.shape
    action_dim = params[-1][0].shape[1]

    # ---- feature-axis padding to the 128-lane width (zero padding is exact) ----
    dims = [in_dim] + [w.shape[1] for (w, _) in params]           # in, h1, ..., act
    dims_p = [_round_up(d, _LANE) for d in dims]

    flat_params = []
    param_specs = []
    for li, (w, b) in enumerate(params):
        d_in, d_out = w.shape
        d_in_p, d_out_p = dims_p[li], dims_p[li + 1]
        w_p = jnp.zeros((d_in_p, d_out_p), jnp.bfloat16)
        w_p = w_p.at[:d_in, :d_out].set(w.astype(jnp.bfloat16))
        b_p = jnp.zeros((1, d_out_p), jnp.float32)
        b_p = b_p.at[0, :d_out].set(b.astype(jnp.float32))
        flat_params.append(w_p)
        flat_params.append(b_p)
        # constant index_map -> weights/biases stay resident in VMEM across grid steps
        param_specs.append(pl.BlockSpec((d_in_p, d_out_p), lambda i: (0, 0)))
        param_specs.append(pl.BlockSpec((1, d_out_p), lambda i: (0, 0)))

    in_dim_p = dims_p[0]
    out_dim_p = dims_p[-1]

    # ---- batch tiling ----
    batch_p = _round_up(batch, _SUBLANE)
    if batch_p <= _TB_DEFAULT:
        tb = batch_p
    else:
        tb = _TB_DEFAULT
        batch_p = _round_up(batch, tb)
    grid = (batch_p // tb,)

    x_p = jnp.zeros((batch_p, in_dim_p), jnp.float32)
    x_p = x_p.at[:batch, :in_dim].set(x.astype(jnp.float32))

    out_p = pl.pallas_call(
        kernel,
        out_shape=jax.ShapeDtypeStruct((batch_p, out_dim_p), jnp.float32),
        grid=grid,
        in_specs=[pl.BlockSpec((tb, in_dim_p), lambda i: (i, 0))] + param_specs,
        out_specs=pl.BlockSpec((tb, out_dim_p), lambda i: (i, 0)),
        compiler_params=pltpu.CompilerParams(
            dimension_semantics=("parallel",),
            vmem_limit_bytes=64 * 1024 * 1024,
        ),
    )(x_p, *flat_params)

    # Slice the real rows / action columns off the lane-dense padded slab.
    return out_p[:batch, :action_dim]


def init_actor_params(key, in_dim, hidden_dims, action_dim):
    """Deterministic PyTorch-style (uniform +/- 1/sqrt(fan_in)) init."""
    dims = [in_dim] + list(hidden_dims)
    params = []
    for d_in, d_out in zip(dims[:-1], dims[1:]):
        key, kw, kb = jax.random.split(key, 3)
        bound = 1.0 / jnp.sqrt(d_in)
        w = jax.random.uniform(kw, (d_in, d_out), jnp.float32, -bound, bound)
        b = jax.random.uniform(kb, (d_out,), jnp.float32, -bound, bound)
        params.append((w, b))
    # final action layer
    key, kw, kb = jax.random.split(key, 3)
    d_in = dims[-1]
    bound = 1.0 / jnp.sqrt(d_in)
    w = jax.random.uniform(kw, (d_in, action_dim), jnp.float32, -bound, bound)
    b = jax.random.uniform(kb, (action_dim,), jnp.float32, -bound, bound)
    params.append((w, b))
    return params


def actor_forward_ref(x, params, *, activation="relu", max_action=1.0):
    act = ACTS[activation]
    h = x.astype(jnp.float32)
    for w, b in params[:-1]:
        h = act(h @ w + b)
    w, b = params[-1]
    return max_action * jnp.tanh(h @ w + b)


if __name__ == "__main__":
    # Synthetic env: obs=10, goal=6 -> input dim 16; hidden_dims=[32, 32];
    # action dim 4; action_max = 2.0; activation 'relu'; batch = 8.
    obs_dim, goal_dim, action_dim = 10, 6, 4
    hidden_dims = [32, 32]
    max_action = 2.0
    batch = 8
    in_dim = obs_dim + goal_dim

    key = jax.random.PRNGKey(0)
    key, kx = jax.random.split(key)
    x = jax.random.normal(kx, (batch, in_dim), jnp.float32)

    params = init_actor_params(key, in_dim, hidden_dims, action_dim)

    actions = actor_forward(x, params, activation="relu", max_action=max_action)
    actions = jax.block_until_ready(actions)

    ref = actor_forward_ref(x, params, activation="relu", max_action=max_action)
    assert actions.shape == (batch, action_dim)
    # bf16 MXU operands -> looser tolerance than the f32-only version.
    assert jnp.allclose(actions, ref, atol=2e-2, rtol=2e-2), (
        f"max abs err {jnp.max(jnp.abs(actions - ref))}")

    print("KERNEL_OK")
</pallas_src>

<mosaic_0001>
module attributes {stable_mosaic.version = 11 : i64} {
  func.func @kernel(%arg0: i32, %arg1: memref<8x128xf32, #tpu.memory_space<vmem>>, %arg2: memref<128x128xbf16, #tpu.memory_space<vmem>>, %arg3: memref<1x128xf32, #tpu.memory_space<vmem>>, %arg4: memref<128x128xbf16, #tpu.memory_space<vmem>>, %arg5: memref<1x128xf32, #tpu.memory_space<vmem>>, %arg6: memref<128x128xbf16, #tpu.memory_space<vmem>>, %arg7: memref<1x128xf32, #tpu.memory_space<vmem>>, %arg8: memref<8x128xf32, #tpu.memory_space<vmem>>) attributes {dimension_semantics = [#tpu.dimension_semantics<parallel>], iteration_bounds = array<i64: 1>, scalar_prefetch = 0 : i64, scratch_operands = 0 : i64, tpu.core_type = #tpu.core_type<tc>, window_params = [{transform_indices = @transform_0, window_bounds = array<i64: 8, 128>}, {pipeline_mode = #tpu.pipeline_mode<synchronous>, transform_indices = @transform_1, window_bounds = array<i64: 128, 128>}, {pipeline_mode = #tpu.pipeline_mode<synchronous>, transform_indices = @transform_2, window_bounds = array<i64: 1, 128>}, {pipeline_mode = #tpu.pipeline_mode<synchronous>, transform_indices = @transform_3, window_bounds = array<i64: 128, 128>}, {pipeline_mode = #tpu.pipeline_mode<synchronous>, transform_indices = @transform_4, window_bounds = array<i64: 1, 128>}, {pipeline_mode = #tpu.pipeline_mode<synchronous>, transform_indices = @transform_5, window_bounds = array<i64: 128, 128>}, {pipeline_mode = #tpu.pipeline_mode<synchronous>, transform_indices = @transform_6, window_bounds = array<i64: 1, 128>}, {transform_indices = @transform_7, window_bounds = array<i64: 8, 128>}]} {
    %c0 = arith.constant 0 : index
    %c0_0 = arith.constant 0 : index
    %0 = vector.load %arg1[%c0, %c0_0] : memref<8x128xf32, #tpu.memory_space<vmem>>, vector<8x128xf32>
    %1 = arith.truncf %0 : vector<8x128xf32> to vector<8x128xbf16>
    %c0_1 = arith.constant 0 : index
    %c0_2 = arith.constant 0 : index
    %2 = vector.load %arg2[%c0_1, %c0_2] : memref<128x128xbf16, #tpu.memory_space<vmem>>, vector<128x128xbf16>
    %c0_3 = arith.constant 0 : index
    %c0_4 = arith.constant 0 : index
    %3 = vector.load %arg3[%c0_3, %c0_4] : memref<1x128xf32, #tpu.memory_space<vmem>>, vector<1x128xf32>
    %cst = arith.constant dense<0.000000e+00> : vector<8x128xf32>
    %4 = tpu.matmul %1, %2, %cst {dimension_numbers = #tpu.dot_dimension_numbers<[1], [0], [0], [1], [0, 0, 1, 1], [], []>} : vector<8x128xbf16>, vector<128x128xbf16>, vector<8x128xf32> -> vector<8x128xf32>
    %5 = vector.broadcast %3 : vector<1x128xf32> to vector<8x128xf32>
    %6 = arith.addf %4, %5 : vector<8x128xf32>
    %cst_5 = arith.constant 0.000000e+00 : f32
    %7 = vector.broadcast %cst_5 : f32 to vector<8x128xf32>
    %8 = arith.maximumf %6, %7 : vector<8x128xf32>
    %9 = arith.truncf %8 : vector<8x128xf32> to vector<8x128xbf16>
    %c0_6 = arith.constant 0 : index
    %c0_7 = arith.constant 0 : index
    %10 = vector.load %arg4[%c0_6, %c0_7] : memref<128x128xbf16, #tpu.memory_space<vmem>>, vector<128x128xbf16>
    %c0_8 = arith.constant 0 : index
    %c0_9 = arith.constant 0 : index
    %11 = vector.load %arg5[%c0_8, %c0_9] : memref<1x128xf32, #tpu.memory_space<vmem>>, vector<1x128xf32>
    %cst_10 = arith.constant dense<0.000000e+00> : vector<8x128xf32>
    %12 = tpu.matmul %9, %10, %cst_10 {dimension_numbers = #tpu.dot_dimension_numbers<[1], [0], [0], [1], [0, 0, 1, 1], [], []>} : vector<8x128xbf16>, vector<128x128xbf16>, vector<8x128xf32> -> vector<8x128xf32>
    %13 = vector.broadcast %11 : vector<1x128xf32> to vector<8x128xf32>
    %14 = arith.addf %12, %13 : vector<8x128xf32>
    %cst_11 = arith.constant 0.000000e+00 : f32
    %15 = vector.broadcast %cst_11 : f32 to vector<8x128xf32>
    %16 = arith.maximumf %14, %15 : vector<8x128xf32>
    %17 = arith.truncf %16 : vector<8x128xf32> to vector<8x128xbf16>
    %c0_12 = arith.constant 0 : index
    %c0_13 = arith.constant 0 : index
    %18 = vector.load %arg6[%c0_12, %c0_13] : memref<128x128xbf16, #tpu.memory_space<vmem>>, vector<128x128xbf16>
    %c0_14 = arith.constant 0 : index
    %c0_15 = arith.constant 0 : index
    %19 = vector.load %arg7[%c0_14, %c0_15] : memref<1x128xf32, #tpu.memory_space<vmem>>, vector<1x128xf32>
    %cst_16 = arith.constant dense<0.000000e+00> : vector<8x128xf32>
    %20 = tpu.matmul %17, %18, %cst_16 {dimension_numbers = #tpu.dot_dimension_numbers<[1], [0], [0], [1], [0, 0, 1, 1], [], []>} : vector<8x128xbf16>, vector<128x128xbf16>, vector<8x128xf32> -> vector<8x128xf32>
    %21 = vector.broadcast %19 : vector<1x128xf32> to vector<8x128xf32>
    %22 = arith.addf %20, %21 : vector<8x128xf32>
    %23 = math.tanh %22 : vector<8x128xf32>
    %cst_17 = arith.constant 2.000000e+00 : f32
    %24 = vector.broadcast %cst_17 : f32 to vector<8x128xf32>
    %25 = arith.mulf %24, %23 : vector<8x128xf32>
    %c0_18 = arith.constant 0 : index
    %c0_19 = arith.constant 0 : index
    %26 = vector.load %arg8[%c0_18, %c0_19] : memref<8x128xf32, #tpu.memory_space<vmem>>, vector<8x128xf32>
    tpu.vector_store %arg8[%c0_18, %c0_19], %25 {strides = array<i32>} : memref<8x128xf32, #tpu.memory_space<vmem>>, vector<8x128xf32>,
    return
  }
  func.func @transform_0(%arg0: i32) -> (i32, i32) {
    %c0_i32 = arith.constant 0 : i32
    %c0_i32_0 = arith.constant 0 : i32
    return %arg0, %c0_i32 : i32, i32
  }
  func.func @transform_1(%arg0: i32) -> (i32, i32) {
    %c0_i32 = arith.constant 0 : i32
    %c0_i32_0 = arith.constant 0 : i32
    %c0_i32_1 = arith.constant 0 : i32
    return %c0_i32, %c0_i32_0 : i32, i32
  }
  func.func @transform_2(%arg0: i32) -> (i32, i32) {
    %c0_i32 = arith.constant 0 : i32
    %c0_i32_0 = arith.constant 0 : i32
    %c0_i32_1 = arith.constant 0 : i32
    return %c0_i32, %c0_i32_0 : i32, i32
  }
  func.func @transform_3(%arg0: i32) -> (i32, i32) {
    %c0_i32 = arith.constant 0 : i32
    %c0_i32_0 = arith.constant 0 : i32
    %c0_i32_1 = arith.constant 0 : i32
    return %c0_i32, %c0_i32_0 : i32, i32
  }
  func.func @transform_4(%arg0: i32) -> (i32, i32) {
    %c0_i32 = arith.constant 0 : i32
    %c0_i32_0 = arith.constant 0 : i32
    %c0_i32_1 = arith.constant 0 : i32
    return %c0_i32, %c0_i32_0 : i32, i32
  }
  func.func @transform_5(%arg0: i32) -> (i32, i32) {
    %c0_i32 = arith.constant 0 : i32
    %c0_i32_0 = arith.constant 0 : i32
    %c0_i32_1 = arith.constant 0 : i32
    return %c0_i32, %c0_i32_0 : i32, i32
  }
  func.func @transform_6(%arg0: i32) -> (i32, i32) {
    %c0_i32 = arith.constant 0 : i32
    %c0_i32_0 = arith.constant 0 : i32
    %c0_i32_1 = arith.constant 0 : i32
    return %c0_i32, %c0_i32_0 : i32, i32
  }
  func.func @transform_7(%arg0: i32) -> (i32, i32) {
    %c0_i32 = arith.constant 0 : i32
    %c0_i32_0 = arith.constant 0 : i32
    return %arg0, %c0_i32 : i32, i32
  }
}

</mosaic_0001>

<bundles_post_ra>
// kernel: actor_forward.1
= control target key start
LH: loop header
LB: loop body
LE: loop exit
PB: predicated region body
PF: predicated region fallthrough
CT: control target
= control target key end

     0   :  { %s534_s1 = inlined_call_operand.vmem [shape: bf16[128,128], index: 1, kind: input, shape index: {}]   ;;  %s535_s3 = inlined_call_operand.vmem [shape: bf16[128,128], index: 3, kind: input, shape index: {}]   ;;  %s536_s2 = inlined_call_operand.vmem [shape: f32[1,128], index: 2, kind: input, shape index: {}]   ;;  %s537_s0 = inlined_call_operand.vmem [shape: f32[8,128], index: 0, kind: input, shape index: {}]   ;;  %s538_s4 = inlined_call_operand.vmem [shape: f32[1,128], index: 4, kind: input, shape index: {}]   ;;  %s539_s5 = inlined_call_operand.vmem [shape: bf16[128,128], index: 5, kind: input, shape index: {}]   ;;  %s540_s6 = inlined_call_operand.vmem [shape: f32[1,128], index: 6, kind: input, shape index: {}]   ;;  %s541_s7 = inlined_call_operand.vmem [shape: f32[8,128], index: 7, kind: output, shape index: {}]  }
   0x1   :  { %v385_v0 = vld [vmem:[%s534_s1 + $0x38] sm:$0xff]  ;;  %v384_v1 = vld [vmem:[%s534_s1 + $0x30] sm:$0xff]  ;;  %v383_v4 = vld [vmem:[%s534_s1 + $0x28] sm:$0xff] }
   0x2   :  { %96 = vmatpush.bf16.msra.mxu0 %v385_v0  ;;  %v393_v2 = vld [vmem:[%s535_s3 + $0x38] sm:$0xff]  ;;  %v392_v3 = vld [vmem:[%s535_s3 + $0x30] sm:$0xff]  ;;  %v391_v5 = vld [vmem:[%s535_s3 + $0x28] sm:$0xff] }
   0x3   :  { %179 = vmatpush.bf16.msra.mxu1 %v393_v2  ;;  %v382_v6 = vld [vmem:[%s534_s1 + $0x20] sm:$0xff]  ;;  %v381_v8 = vld [vmem:[%s534_s1 + $0x18] sm:$0xff]  ;;  %v380_v10 = vld [vmem:[%s534_s1 + $0x10] sm:$0xff] }
   0x4   :  { %v390_v7 = vld [vmem:[%s535_s3 + $0x20] sm:$0xff]  ;;  %v389_v9 = vld [vmem:[%s535_s3 + $0x18] sm:$0xff]  ;;  %v388_v11 = vld [vmem:[%s535_s3 + $0x10] sm:$0xff] }
   0x5   :  { %v379_v12 = vld [vmem:[%s534_s1 + $0x8] sm:$0xff]  ;;  %v378_v13 = vld [vmem:[%s534_s1] sm:$0xff]  ;;  %v401_v18 = vld [vmem:[%s539_s5 + $0x38] sm:$0xff] }
   0x6   :  { %97 = vmatpush.bf16.msra.mxu0 %v384_v1  ;;  %v26_v14 = vld [vmem:[%s537_s0] sm:$0xff]  ;;  %v387_v16 = vld [vmem:[%s535_s3 + $0x8] sm:$0xff]  ;;  %262 = vmatpush.bf16.msra.mxu2 %v401_v18  ;;  %v400_v19 = vld [vmem:[%s539_s5 + $0x30] sm:$0xff] }
   0x7   :  { %180 = vmatpush.bf16.msra.mxu1 %v392_v3  ;;  %v27_v15 = vpack.c.bf16 %v26_v14, %v26_v14  ;;  %v386_v17 = vld [vmem:[%s535_s3] sm:$0xff]  ;;  %v399_v20 = vld [vmem:[%s539_s5 + $0x28] sm:$0xff]  ;;  %v397_v22 = vld [vmem:[%s539_s5 + $0x18] sm:$0xff] }
   0x8   :  { %v398_v21 = vld [vmem:[%s539_s5 + $0x20] sm:$0xff]  ;;  %v396_v23 = vld [vmem:[%s539_s5 + $0x10] sm:$0xff]  ;;  %v395_v30 = vld [vmem:[%s539_s5 + $0x8] sm:$0xff] }
   0x9   :  { %v402_v24 = vld [vmem:[%s536_s2] ss:$0 sm:$0xff] }
   0xa   :  { %98 = vmatpush.bf16.msra.mxu0 %v383_v4  ;;  %263 = vmatpush.bf16.msra.mxu2 %v400_v19  ;;  %v394_v31 = vld [vmem:[%s539_s5] sm:$0xff] }
   0xb   :  { %181 = vmatpush.bf16.msra.mxu1 %v391_v5  ;;  %v403_v32 = vld [vmem:[%s538_s4] ss:$0 sm:$0xff] }
   0xc   :  { %v404_v38 = vld [vmem:[%s540_s6] ss:$0 sm:$0xff] }
   0xe   :  { %99 = vmatpush.bf16.msra.mxu0 %v382_v6  ;;  %264 = vmatpush.bf16.msra.mxu2 %v399_v20 }
   0xf   :  { %182 = vmatpush.bf16.msra.mxu1 %v390_v7 }
  0x12   :  { %100 = vmatpush.bf16.msra.mxu0 %v381_v8  ;;  %265 = vmatpush.bf16.msra.mxu2 %v398_v21 }
  0x13   :  { %183 = vmatpush.bf16.msra.mxu1 %v389_v9 }
  0x16   :  { %101 = vmatpush.bf16.msra.mxu0 %v380_v10  ;;  %266 = vmatpush.bf16.msra.mxu2 %v397_v22 }
  0x17   :  { %184 = vmatpush.bf16.msra.mxu1 %v388_v11 }
  0x1a   :  { %102 = vmatpush.bf16.msra.mxu0 %v379_v12  ;;  %267 = vmatpush.bf16.msra.mxu2 %v396_v23 }
  0x1b   :  { %185 = vmatpush.bf16.msra.mxu1 %v387_v16 }
  0x1e   :  { %103 = vmatpush.bf16.msra.mxu0 %v378_v13  ;;  %268 = vmatpush.bf16.msra.mxu2 %v395_v30 }
  0x1f   :  { %186 = vmatpush.bf16.msra.mxu1 %v386_v17 }
  0x21   :  { %104 = vmatmul.bf16.vlgmr.msra.gmra.mxu0 %v27_v15 }
  0x22   :  { %269 = vmatpush.bf16.msra.mxu2 %v394_v31 }
  0x9e   :  { %v105_v25 = vpop.f32.mrf.mxu0 }
  0x9f   :  { %v106_v26 = vadd.f32 %v402_v24, %v105_v25 }
  0xa1   :  { %v109_v27 = vmax.f32 %v106_v26, 0.0 }
  0xa3   :  { %v110_v28 = vpack.c.bf16 %v109_v27, %v109_v27 }
  0xa5   :  { %187 = vmatmul.bf16.vlgmr.msra.gmra.mxu1 %v110_v28 }
  0xa6   :  { %v107_v29 = vpop.f32.mrf.mxu0 }
 0x122   :  { %v188_v33 = vpop.f32.mrf.mxu1 }
 0x123   :  { %v189_v34 = vadd.f32 %v403_v32, %v188_v33 }
 0x125   :  { %v192_v35 = vmax.f32 %v189_v34, 0.0 }
 0x127   :  { %v193_v36 = vpack.c.bf16 %v192_v35, %v192_v35 }
 0x129   :  { %270 = vmatmul.bf16.vlgmr.msra.gmra.mxu2 %v193_v36 }
 0x12a   :  { %v190_v37 = vpop.f32.mrf.mxu1 }
 0x1ac   :  { %v271_v39 = vpop.f32.mrf.mxu2 }
 0x1ad   :  { %v272_v40 = vadd.f32 %v404_v38, %v271_v39 }
 0x1af   :  { %405 = vtanh.f32 %v272_v40 }
 0x1b4   :  { %v273_v41 = vpop.f32.mrf.mxu2 }
 0x1b5   :  { %v406_v42 = vpop.eup %405 }
 0x1b6   :  { %v276_v43 = vmul.f32 2.0, %v406_v42 }
 0x1b8   :  { %277 = vst [vmem:[%s541_s7] sm:$0xff] %v276_v43 }

</bundles_post_ra>
